<compile_context>
chip_gen: v7x
topology: tpu7x:2x2x1
jax: 0.10.0
libtpu: 0.0.40
codegen_flags: <defaults>
</compile_context>

<pallas_src>
import jax
import jax.numpy as jnp
from jax import lax
from jax.experimental import pallas as pl
from jax.experimental.pallas import tpu as pltpu


def _round_up(a, b):
    return (a + b - 1) // b * b


def _patch_proj_kernel(x_ref, w_ref, b_ref, o_ref):
    # x_ref: (TM, K)  streamed tile of flattened patches (f32 or bf16)
    # w_ref: (K, E)   projection weight, resident in VMEM across the grid
    # b_ref: (1, E)   bias, kept f32 (epilogue stays f32)
    # o_ref: (TM, E)  output tile, cast on store
    acc = jnp.dot(x_ref[...], w_ref[...], preferred_element_type=jnp.float32)
    o_ref[...] = (acc + b_ref[...]).astype(o_ref.dtype)


def prepare_projection(weight, bias, compute_dtype=None):
    """One-time precompute: conv weight (E, C, P, P) -> (K, E) matrix, bias -> (1, E) f32."""
    E = weight.shape[0]
    K = weight.shape[1] * weight.shape[2] * weight.shape[3]
    w2d = weight.reshape(E, K).T                       # (K, E), rows ordered (c, kh, kw)
    if compute_dtype is not None:
        w2d = w2d.astype(compute_dtype)
    b2d = bias.astype(jnp.float32).reshape(1, E)
    return w2d, b2d


def patch_partition_forward(x, weight, bias, patch_size, *, tm=None,
                            compute_dtype=None, out_dtype=None,
                            projection=None):
    """x: (B, C, H, W) NCHW; weight: (embed_dim, C, P, P); bias: (embed_dim,).

    Returns (B, num_patches, embed_dim) — matches PyTorch
    Conv2d(...).flatten(2).transpose(-2, -1) with norm_layer=None.
    """
    B, C, H, W = x.shape
    P = patch_size
    E = weight.shape[0]
    Hp, Wp = H // P, W // P
    num_patches = Hp * Wp
    K = C * P * P
    out_dtype = x.dtype if out_dtype is None else out_dtype

    # ---- layout glue: image -> flattened patches, rows ordered (c, kh, kw) ----
    # Cast early so the (one-time) XLA transpose moves half the bytes in bf16.
    if compute_dtype is not None:
        x = x.astype(compute_dtype)
    xp = x.reshape(B, C, Hp, P, Wp, P)
    xp = jnp.transpose(xp, (0, 2, 4, 1, 3, 5))          # (B, Hp, Wp, C, P, P)
    xp = xp.reshape(B * num_patches, K)                  # (M, K)
    M = xp.shape[0]

    if projection is None:
        w2d, b2d = prepare_projection(weight, bias, compute_dtype)
    else:
        w2d, b2d = projection

    # M-tile: as large as VMEM comfortably allows (overhead-bound otherwise).
    # Sublane quantum 16 if any 16-bit dtype is involved (bf16 packing), else 8.
    itemsizes = (jnp.dtype(xp.dtype).itemsize, jnp.dtype(out_dtype).itemsize)
    q = 16 if min(itemsizes) == 2 else 8
    if tm is None:
        tm = 8192                                       # good on v5e/v6e, best on v7x
    tm = max(q, _round_up(min(tm, _round_up(M, q)), q))

    x_bytes = jnp.dtype(xp.dtype).itemsize
    w_bytes = jnp.dtype(w2d.dtype).itemsize
    o_bytes = jnp.dtype(out_dtype).itemsize
    cost = pl.CostEstimate(
        flops=2 * M * K * E,
        transcendentals=0,
        bytes_accessed=M * K * x_bytes + K * E * w_bytes + E * 4 + M * E * o_bytes,
    )

    out = pl.pallas_call(
        _patch_proj_kernel,
        out_shape=jax.ShapeDtypeStruct((M, E), out_dtype),
        grid_spec=pltpu.PrefetchScalarGridSpec(
            num_scalar_prefetch=0,
            grid=(pl.cdiv(M, tm),),
            in_specs=[
                pl.BlockSpec((tm, K), lambda i: (i, 0)),   # streamed X tiles
                pl.BlockSpec((K, E), lambda i: (0, 0)),    # weight resident in VMEM
                pl.BlockSpec((1, E), lambda i: (0, 0)),    # bias resident in VMEM
            ],
            out_specs=pl.BlockSpec((tm, E), lambda i: (i, 0)),
        ),
        compiler_params=pltpu.CompilerParams(
            # Rows are independent -> v7x's two TensorCores split the M grid.
            dimension_semantics=("parallel",),
            vmem_limit_bytes=32 * 1024 * 1024,
        ),
        cost_estimate=cost,
    )(xp, w2d, b2d)

    return out.reshape(B, num_patches, E)                # free metadata reshape


if __name__ == "__main__":
    # Small shapes consistent with the module: img_size=16, patch_size=4,
    # in_chans=4, embed_dim=32, batch=2.  norm_layer=None (default) -> no norm.
    B, C, H, W = 2, 4, 16, 16
    P = 4
    E = 32

    key = jax.random.PRNGKey(0)
    kx, kw, kb = jax.random.split(key, 3)
    x = jax.random.normal(kx, (B, C, H, W), dtype=jnp.float32)
    weight = jax.random.normal(kw, (E, C, P, P), dtype=jnp.float32) * 0.05
    bias = jax.random.normal(kb, (E,), dtype=jnp.float32) * 0.05

    # Reference: plain-JAX strided conv, flatten(2), transpose — PyTorch semantics.
    ref = lax.conv_general_dilated(
        x, weight, window_strides=(P, P), padding="VALID",
        dimension_numbers=("NCHW", "OIHW", "NCHW"))
    ref = ref + bias[None, :, None, None]
    ref = ref.reshape(B, E, -1).transpose(0, 2, 1)        # (B, num_patches, E)

    NP = (H // P) * (W // P)

    # 1) f32, small tm so even this toy problem exercises a multi-step grid.
    out = patch_partition_forward(x, weight, bias, P, tm=8)
    out = jax.block_until_ready(out)
    assert out.shape == (B, NP, E), out.shape
    assert jnp.allclose(out, ref, atol=1e-4, rtol=1e-4), \
        float(jnp.max(jnp.abs(out - ref)))

    # 2) default (large-tile) path.
    out_d = patch_partition_forward(x, weight, bias, P)
    out_d = jax.block_until_ready(out_d)
    assert out_d.shape == (B, NP, E)
    assert jnp.allclose(out_d, ref, atol=1e-4, rtol=1e-4), \
        float(jnp.max(jnp.abs(out_d - ref)))

    # 3) bf16 inputs + bf16 output (f32 MXU accumulate + f32 bias inside kernel).
    out_bf16 = patch_partition_forward(x, weight, bias, P,
                                       compute_dtype=jnp.bfloat16,
                                       out_dtype=jnp.bfloat16)
    out_bf16 = jax.block_until_ready(out_bf16)
    assert out_bf16.shape == (B, NP, E)
    assert out_bf16.dtype == jnp.bfloat16
    assert jnp.allclose(out_bf16.astype(jnp.float32), ref, atol=6e-2, rtol=6e-2), \
        float(jnp.max(jnp.abs(out_bf16.astype(jnp.float32) - ref)))

    print("KERNEL_OK")
</pallas_src>

<mosaic_0001>
module attributes {stable_mosaic.version = 11 : i64} {
  func.func @_patch_proj_kernel(%arg0: i32, %arg1: memref<8x64xf32, #tpu.memory_space<vmem>>, %arg2: memref<64x32xf32, #tpu.memory_space<vmem>>, %arg3: memref<1x32xf32, #tpu.memory_space<vmem>>, %arg4: memref<8x32xf32, #tpu.memory_space<vmem>>) attributes {dimension_semantics = [#tpu.dimension_semantics<parallel>], iteration_bounds = array<i64: 4>, scalar_prefetch = 0 : i64, scratch_operands = 0 : i64, tpu.core_type = #tpu.core_type<tc>, window_params = [{transform_indices = @transform_0, window_bounds = array<i64: 8, 64>}, {pipeline_mode = #tpu.pipeline_mode<synchronous>, transform_indices = @transform_1, window_bounds = array<i64: 64, 32>}, {pipeline_mode = #tpu.pipeline_mode<synchronous>, transform_indices = @transform_2, window_bounds = array<i64: 1, 32>}, {transform_indices = @transform_3, window_bounds = array<i64: 8, 32>}]} {
    %c0 = arith.constant 0 : index
    %c0_0 = arith.constant 0 : index
    %0 = vector.load %arg1[%c0, %c0_0] : memref<8x64xf32, #tpu.memory_space<vmem>>, vector<8x64xf32>
    %c0_1 = arith.constant 0 : index
    %c0_2 = arith.constant 0 : index
    %1 = vector.load %arg2[%c0_1, %c0_2] : memref<64x32xf32, #tpu.memory_space<vmem>>, vector<64x32xf32>
    %cst = arith.constant dense<0.000000e+00> : vector<8x32xf32>
    %2 = tpu.matmul %0, %1, %cst {dimension_numbers = #tpu.dot_dimension_numbers<[1], [0], [0], [1], [0, 0, 1, 1], [], []>} : vector<8x64xf32>, vector<64x32xf32>, vector<8x32xf32> -> vector<8x32xf32>
    %c0_3 = arith.constant 0 : index
    %c0_4 = arith.constant 0 : index
    %3 = vector.load %arg3[%c0_3, %c0_4] : memref<1x32xf32, #tpu.memory_space<vmem>>, vector<1x32xf32>
    %4 = vector.broadcast %3 : vector<1x32xf32> to vector<8x32xf32>
    %5 = arith.addf %2, %4 : vector<8x32xf32>
    %c0_5 = arith.constant 0 : index
    %c0_6 = arith.constant 0 : index
    %6 = vector.load %arg4[%c0_5, %c0_6] : memref<8x32xf32, #tpu.memory_space<vmem>>, vector<8x32xf32>
    tpu.vector_store %arg4[%c0_5, %c0_6], %5 {strides = array<i32>} : memref<8x32xf32, #tpu.memory_space<vmem>>, vector<8x32xf32>,
    return
  }
  func.func @transform_0(%arg0: i32) -> (i32, i32) {
    %c0_i32 = arith.constant 0 : i32
    %c0_i32_0 = arith.constant 0 : i32
    return %arg0, %c0_i32 : i32, i32
  }
  func.func @transform_1(%arg0: i32) -> (i32, i32) {
    %c0_i32 = arith.constant 0 : i32
    %c0_i32_0 = arith.constant 0 : i32
    %c0_i32_1 = arith.constant 0 : i32
    return %c0_i32, %c0_i32_0 : i32, i32
  }
  func.func @transform_2(%arg0: i32) -> (i32, i32) {
    %c0_i32 = arith.constant 0 : i32
    %c0_i32_0 = arith.constant 0 : i32
    %c0_i32_1 = arith.constant 0 : i32
    return %c0_i32, %c0_i32_0 : i32, i32
  }
  func.func @transform_3(%arg0: i32) -> (i32, i32) {
    %c0_i32 = arith.constant 0 : i32
    %c0_i32_0 = arith.constant 0 : i32
    return %arg0, %c0_i32 : i32, i32
  }
}

</mosaic_0001>

<bundles_post_ra>
// kernel: tpu_custom_call.1
= control target key start
LH: loop header
LB: loop body
LE: loop exit
PB: predicated region body
PF: predicated region fallthrough
CT: control target
= control target key end

     0   :  { %8 = vsyncpa [#allocation3], 0  ;;  %s640_s0 = inlined_call_operand.vmem [shape: f32[32,64], index: 0, kind: input, shape index: {}]   ;;  %s641_s1 = inlined_call_operand.vmem [shape: f32[64,32], index: 1, kind: input, shape index: {}]   ;;  %s642_s2 = inlined_call_operand.vmem [shape: f32[1,32], index: 2, kind: input, shape index: {}]   ;;  %s643_s3 = inlined_call_operand.hbm [shape: f32[32,32], index: 3, kind: output, shape index: {}]  }
   0x1   :  { %10 = vsyncpa [#allocation3 + $0x1], 0  ;;  %s513_s12 = smov 0   ;;  %s515_s13 = smov 0  }
   0x2   :  { %s517_s14 = smov 0   ;;  %s519_s15 = smov 0  }
   0x3 LB: > { %s534_s16 = sadd.s32 4294967295, %s487_s15   ;;  %s331_s17 = sadd.s32 4294967294, %s487_s15   ;;  %s487_s15 = sphi %s519_s15, %s649_s15   ;;  %s483_s14 = sphi %s517_s14, %s648_s14   ;;  %s479_s13 = sphi %s515_s13, %s647_s13   ;;  %s475_s12 = sphi %s513_s12, %s646_s12  }
   0x4   : > { %s538_s18 = sadd.s32 1, %s487_s15   ;;  %s91_s19 = sadd.s32 1, %s483_s14 }
   0x5   : > { %s88_s20 = ssub.s32 %s487_s15, %s538_s18  ;;  %p101_p0 = scmp.ne.s32.totalorder %s483_s14, %s479_s13 }
   0x6   : > { %p89_p1 = scmp.eq.s32.totalorder %s88_s20, 0  ;;  %p102_p2 = scmp.eq.s32.totalorder %s534_s16, 3 }
   0x7   : > { %p107_p3 = scmp.ne.s32.totalorder %s479_s13, %s475_s12  ;;  %p108_p4 = scmp.eq.s32.totalorder %s331_s17, 3 }
   0x8   : > { %s549_s21 = scalar_select %p89_p1, %s483_s14, %s91_s19  }
   0x9   : > { %p551_p5 = por %p102_p2, %p101_p0  ;;  %p555_p6 = por %p108_p4, %p107_p3 }
   0xa   : > { %p334_p7 = scmp.ge.s32.totalorder %s487_s15, 1  ;;  %p139_p8 = scmp.lt.s32.totalorder %s487_s15, 5 }
   0xc   : > { %p140_p9 = pnand %p334_p7, %p139_p8 }
   0xd   : > { %v167_v0 = vld [vmem:[%s641_s1] sm:$0xff] (!%p140_p9)  ;;  %v168_v1 = vld [vmem:[%s641_s1 + $0x8] sm:$0xff] (!%p140_p9)  ;;  %v169_v2 = vld [vmem:[%s641_s1 + $0x10] sm:$0xff] (!%p140_p9)  ;;  %v489_v3 = vmov (!%p140_p9), 0.0|0.0   ;;  %vm490_vm0 = vmmov (!%p140_p9), 0   ;;  %v491_v6 = vmov (!%p140_p9), 0.0  }
   0xe   : > { %143 = sbr.rel (%p140_p9) target bundleno = 259 (0x103), region = 32  ;;  %371 = vmatprep.subr.bf16.mxu0 (!%p140_p9), %v489_v3  ;;  %v372_v4 = vpack.c.bf16 (!%p140_p9), %v168_v1, %v167_v0  ;;  %v170_v5 = vld [vmem:[%s641_s1 + $0x18] sm:$0xff] (!%p140_p9)  ;;  %368 = vmatprep.mubr.msk.f32.mxu0 (!%p140_p9), %vm490_vm0, %v491_v6  ;;  %p162_p10 = scmp.lt.s32.totalorder (!%p140_p9), %s534_s16, 3  ;;  %v171_v8 = vld [vmem:[%s641_s1 + $0x20] sm:$0xff] (!%p140_p9)  ;;  %v172_v9 = vld [vmem:[%s641_s1 + $0x28] sm:$0xff] (!%p140_p9)  ;;  %vm182_vm1 = vcmask (!%p140_p9), 523264  }
   0xf   : > { %v375_v7 = vpack.c.bf16 (!%p140_p9), %v170_v5, %v169_v2  ;;  %v378_v10 = vpack.c.bf16 (!%p140_p9), %v172_v9, %v171_v8  ;;  %v173_v11 = vld [vmem:[%s641_s1 + $0x30] sm:$0xff] (!%p140_p9)  ;;  %v174_v12 = vld [vmem:[%s641_s1 + $0x38] sm:$0xff] (!%p140_p9)  ;;  %s159_s27 = sand.u32 (!%p140_p9), 1, %s479_s13   ;;  %v337_v15 = vld [vmem:[%s642_s2] ss:$0 sm:$0xff] (!%p140_p9)  ;;  %s340_s4 = sshll.u32 (!%p140_p9), %s534_s16, 7 }
  0x10   : > { %373 = vmatpush3.bf16.msra.mxu0 (!%p140_p9), %v372_v4  ;;  %v381_v13 = vpack.c.bf16 (!%p140_p9), %v174_v12, %v173_v11  ;;  %s335_s28 = sshll.u32 (!%p140_p9), %s159_s27, 3  ;;  %vm256_vm2 = vcmask (!%p140_p9), 261120   ;;  %s259_s10 = scalar_lea.sflag (!%p140_p9), [#allocation3], %s159_s27 }
  0x11   : > { %374 = vmatprep.subr.bf16.mxu0 (!%p140_p9), %v489_v3  ;;  %s161_s5 = scalar_lea.vmem (!%p140_p9), [#allocation2], %s335_s28 }
  0x12   : > { %s272_s6 = sshll.u32 (!%p140_p9), %s161_s5, 4  ;;  %s600_s6 = int_to_ptr.vmem [resolvable:$true] %s272_s6 }
  0x13   : > { %s425_s11 = scalar_lea.vmem (!%p140_p9), %s600_s6, 128 }
  0x14   : > { %376 = vmatpush3.bf16.msra.mxu0 (!%p140_p9), %v375_v7  ;;  %p426_p11 = scmp.ne.s32.totalorder (!%p140_p9), %s600_s6, %s425_s11 }
  0x15   : > { %s163_s9 = scalar_select %p162_p10, %s534_s16, 3  ;;  %377 = vmatprep.subr.bf16.mxu0 %v489_v3 }
  0x16   : > { %p427_p12 = pnand %p426_p11, %p551_p5  ;;  %s492_s16 = smov [#allocation2]  }
  0x17   : > { %s336_s20 = sshll.u32 %s163_s9, 3  ;;  %s598_s9 = scalar_lea.hbm %s643_s3, %s340_s4 }
  0x18   : > { %379 = vmatpush3.bf16.msra.mxu0 %v378_v10  ;;  %s165_s26 = scalar_lea.vmem %s640_s0, %s336_s20  ;;  %p428_p13 = pneg %p427_p12 }
  0x19   : > { %380 = vmatprep.subr.bf16.mxu0 %v489_v3  ;;  %v166_v14 = vld [vmem:[%s165_s26] sm:$0xff]  ;;  %s429_s17 = sshll.u32 %s492_s16, 4  ;;  %s430_s17 = int_to_ptr.vmem [resolvable:$false] %s429_s17 }
  0x1a   : > { %s431_s19 = scalar_lea.vmem %s430_s17, 256  ;;  %p432_p0 = scmp.lt.s32.totalorder %s600_s6, %s430_s17 }
  0x1b   : > { %p433_p1 = scmp.lt.s32.totalorder %s431_s19, %s425_s11 }
  0x1c   : > { %382 = vmatpush3.bf16.msra.mxu0 %v381_v13 }
  0x1d   : > { %p434_p2 = por %p433_p1, %p432_p0 }
  0x1f   : > { %369 = vmatmul.mubr.msk.f32.vlgmr.msra.gmra.mrb[0].mxu0 %vm182_vm1, %v166_v14  ;;  %p435_p3 = pnand %p434_p2, %p428_p13 }
  0xf2   : > { %v252_v16 = vpop.f32.mrb[0].mxu0 }
  0xf3   : > { %v253_v17 = vadd.f32 %v337_v15, %v252_v16  ;;  %v370_v18 = vpop.f32.mrb[1].mxu0 }
  0xf5   : > { %257 = vst.msk [vmem:[%s161_s5] sm:$0xff] %vm256_vm2, %v253_v17 }
  0xf6   : > { %438 = shalt.err (!%p435_p3)
}
  0xf7   : > { %s439_s20 = scalar_lea.hbm %s598_s9, 128  ;;  %s443_s26 = scalar_lea.hbm %s643_s3, 512 }
  0xf8   : > { %p440_p4 = scmp.ne.s32.totalorder %s598_s9, %s439_s20  ;;  %p444_p9 = scmp.lt.u32.totalorder %s598_s9, %s643_s3 }
  0xf9   : > { %p445_p10 = scmp.lt.u32.totalorder %s443_s26, %s439_s20  ;;  %p447_p12 = scmp.lt.u32.totalorder %s439_s20, %s598_s9 }
  0xfa   : > { %p441_p7 = pnand %p440_p4, %p551_p5 }
  0xfb   : > { %p446_p11 = por %p445_p10, %p444_p9 }
  0xfc   : > { %p442_p8 = pneg %p441_p7 }
  0xfd   : > { %p448_p13 = por %p447_p12, %p446_p11 }
  0xff   : > { %p449_p0 = pnand %p448_p13, %p442_p8 }
 0x101   : > { %452 = shalt.err (!%p449_p0)
}
 0x102   : > { %383 = dma.vmem_to_hbm [thread:$0]  (%p551_p5), %s600_s6, 128, %s598_s9, %s259_s10  }
 0x103 PF: > { %p389_p1 = scmp.ge.s32.totalorder %s487_s15, 2  ;;  %s284_s29 = sand.u32 1, %s475_s12  }
 0x104   : > { %s285_s30 = scalar_lea.sflag [#allocation3], %s284_s29 }
 0x105   : > { %p386_p2 = pnand %p389_p1, %p555_p6 }
 0x107   : > { %470 = dma.done.wait (!%p386_p2), %s285_s30, 128  }
 0x108   : > { %472 = vsyncadd (!%p386_p2), %s285_s30, 4294967168  ;;  %p13_p3 = scmp.ge.s32.totalorder %s538_s18, 6   ;;  %s646_s12 = smov %s479_s13 }
 0x109   : > { %s647_s13 = smov %s483_s14  ;;  %s648_s14 = smov %s549_s21 }
 0x10a   : > { %s649_s15 = smov %s538_s18  ;;  %15 = sbr.rel (!%p13_p3) target bundleno = 3 (0x3), region = 67 }
 0x111   :  { %290 = vsyncpa [#allocation3], 1 }
 0x112   :  { %292 = vsyncpa [#allocation3 + $0x1], 1 }

</bundles_post_ra>
